<compile_context>
chip_gen: v5e
topology: v5e:2x2
jax: 0.10.0
libtpu: 0.0.40
codegen_flags: <defaults>
</compile_context>

<pallas_src>
import numpy as np
import jax
import jax.numpy as jnp
from jax.experimental import pallas as pl
from jax.experimental.pallas import tpu as pltpu

_LANES = 128
_SUBLANES = 8


def _round_up(x, m):
    return ((x + m - 1) // m) * m


# ----------------------------------------------------------------------------
# Kernel 1: AttenMech gate for a tile of edges (edges on the lane axis).
#   x_ref    : (bt, D, 128)  edge embeddings (edge index = lane)
#   w_ref    : (D, 1)        folded attention vector
#   c_ref    : (1, 1)        folded bias
#   gate_ref : (bt, 1, 128)  lane-dense gates
# ----------------------------------------------------------------------------
def _gate_kernel(x_ref, w_ref, c_ref, gate_ref):
    w = w_ref[...]                       # (D, 1) broadcasts over lanes
    c = c_ref[...]                       # (1, 1)
    for t in range(x_ref.shape[0]):      # static unroll over lane-tiles in block
        x = x_ref[t]                                      # (D, 128)
        s = jnp.sum(x * w, axis=0, keepdims=True) + c     # (1, 128)
        gate_ref[t] = jnp.where(s > 0.0, s, 0.01 * s)     # leaky_relu(0.01)


def atten_mech_gate(edge_embs, w_eff, c_eff, *, block_lane_tiles=4):
    """edge_embs: (E, D) f32 -> (E,) f32 gates = leaky_relu(edge . w_eff + c)."""
    E, D = edge_embs.shape
    n_tiles = pl.cdiv(E, _LANES)
    bt = max(1, min(block_lane_tiles, n_tiles))
    T = _round_up(n_tiles, bt)
    E_pad = T * _LANES

    # Lane-major layout plumbing (wrapper-side pad/reshape/transpose fuses with
    # the gather that produced edge_embs); makes the gate output lane-dense.
    x = jnp.zeros((E_pad, D), jnp.float32).at[:E].set(edge_embs)
    x = x.reshape(T, _LANES, D).transpose(0, 2, 1)        # (T, D, 128)

    w = jnp.reshape(w_eff, (D, 1)).astype(jnp.float32)
    c = jnp.reshape(c_eff, (1, 1)).astype(jnp.float32)

    out = pl.pallas_call(
        _gate_kernel,
        out_shape=jax.ShapeDtypeStruct((T, 1, _LANES), jnp.float32),
        grid=(T // bt,),
        in_specs=[
            pl.BlockSpec((bt, D, _LANES), lambda i: (i, 0, 0)),
            pl.BlockSpec((D, 1), lambda i: (0, 0)),
            pl.BlockSpec((1, 1), lambda i: (0, 0)),
        ],
        out_specs=pl.BlockSpec((bt, 1, _LANES), lambda i: (i, 0, 0)),
        compiler_params=pltpu.CompilerParams(
            dimension_semantics=("parallel",)),   # sharded across v7x's 2 TCs
    )(x, w, c)
    return out.reshape(E_pad)[:E]


# ----------------------------------------------------------------------------
# Kernel 2: row-normalized aggregation  out = (W / W.sum(1, keepdims=True)) @ E
# Tiled matmul with f32 accumulator; row-sum accumulated alongside and applied
# once post-matmul as a reciprocal multiply (B*D work instead of B*U divides).
# ----------------------------------------------------------------------------
def _aggregate_kernel(w_ref, emb_ref, out_ref, acc_ref, rsum_ref):
    k = pl.program_id(2)

    @pl.when(k == 0)
    def _():
        acc_ref[...] = jnp.zeros_like(acc_ref)
        rsum_ref[...] = jnp.zeros_like(rsum_ref)

    w = w_ref[...]
    acc_ref[...] += jnp.dot(w, emb_ref[...], preferred_element_type=jnp.float32)
    rsum_ref[...] += jnp.sum(w, axis=1, keepdims=True)

    @pl.when(k == pl.num_programs(2) - 1)
    def _():
        # Zero row-sums only occur for wrapper padding rows; real rows have a
        # nonzero gate sum (documented precondition, as in the PyTorch code).
        rs = rsum_ref[...]
        rs = jnp.where(rs == 0.0, 1.0, rs)
        inv = pl.reciprocal(rs, approx=False)  # approx=True is fine at prod scale
        out_ref[...] = (acc_ref[...] * inv).astype(out_ref.dtype)


def aggregate(weight_matrix, embed_matrix):
    B, U = weight_matrix.shape
    U2, D = embed_matrix.shape
    assert U == U2

    # MXU-friendly padding / tiling: M to 8, K/N to 128 (also serves v5e's
    # 128x128 MXU; bump tk/tn toward 256/512 on v6e/v7x at production scale).
    tm = min(_round_up(B, _SUBLANES), 128)
    tk = min(_round_up(U, _LANES), 512)
    tn = min(_round_up(D, _LANES), 512)
    B_pad, U_pad, D_pad = _round_up(B, tm), _round_up(U, tk), _round_up(D, tn)
    # Per-step VMEM <= 2*(tm*tk + tk*tn)*4 + tm*tn*4 bytes (~3 MiB at the
    # largest tiles above) -- well inside v7x's 32 MiB scoped / 64 MiB VMEM.

    Wp = jnp.zeros((B_pad, U_pad), jnp.float32).at[:B, :U].set(weight_matrix)
    Ep = jnp.zeros((U_pad, D_pad), jnp.float32).at[:U, :D].set(embed_matrix)
    # TODO(synk): at production scale cast Wp/Ep to bfloat16 here (keep the f32
    # accumulator) to hit the v6e/v7x MXU bf16 rate.

    out = pl.pallas_call(
        _aggregate_kernel,
        out_shape=jax.ShapeDtypeStruct((B_pad, D_pad), jnp.float32),
        grid=(B_pad // tm, D_pad // tn, U_pad // tk),
        in_specs=[
            pl.BlockSpec((tm, tk), lambda i, j, k: (i, k)),
            pl.BlockSpec((tk, tn), lambda i, j, k: (k, j)),
        ],
        out_specs=pl.BlockSpec((tm, tn), lambda i, j, k: (i, j)),
        scratch_shapes=[
            pltpu.VMEM((tm, tn), jnp.float32),   # matmul accumulator
            pltpu.VMEM((tm, 1), jnp.float32),    # row-sum accumulator
        ],
        compiler_params=pltpu.CompilerParams(
            dimension_semantics=("parallel", "parallel", "arbitrary")),
    )(Wp, Ep)
    return out[:B, :D]


# ----------------------------------------------------------------------------
# Host-side graph glue (mirrors the aggregator's python bookkeeping).
# ----------------------------------------------------------------------------
def deterministic_sampler(nodes, num_sample, num_total_nodes):
    samp_neighs = [set(((n * 3 + k + 1) % num_total_nodes) for k in range(num_sample))
                   for n in nodes]
    return samp_neighs, None


def _build_edges(nodes, num_sample, num_total_nodes):
    samp_neighs, _ = deterministic_sampler(nodes, num_sample, num_total_nodes)
    unique_nodes_list = sorted(set.union(*samp_neighs))
    unique_nodes = {n: i for i, n in enumerate(unique_nodes_list)}
    column_indices = [unique_nodes[n] for sn in samp_neighs for n in sn]
    row_indices = [i for i in range(len(samp_neighs)) for _ in range(len(samp_neighs[i]))]
    node_a_list = [nodes[i] for i in row_indices]
    return row_indices, column_indices, node_a_list, unique_nodes_list


def fold_atten_mech_params(W1, b1, W2, b2):
    """Exact algebraic fold of AttenMech's two Linear layers."""
    mid = W1.shape[0]
    w2a, w2b = W2[0, :mid], W2[0, mid:]
    wa_eff = W1.T @ w2a
    wb_eff = W1.T @ w2b
    c_eff = b1 @ (w2a + w2b) + b2[0]
    return wa_eff, wb_eff, c_eff


def atten_aggregator_forward(feature_table, W1, b1, W2, b2, nodes, num_sample=10):
    nodes = [int(n) for n in nodes]
    N, D = feature_table.shape
    row_idx, col_idx, node_a_list, uniq = _build_edges(nodes, num_sample, N)
    B, U = len(nodes), len(uniq)

    # Single gather: the non-cuda branch feeds node_a embeddings to BOTH
    # AttenMech inputs, so the duplicate b gather / kernel input is dropped.
    a_embs = feature_table[jnp.asarray(node_a_list, dtype=jnp.int32)]       # (E, D)

    wa_eff, wb_eff, c_eff = fold_atten_mech_params(W1, b1, W2, b2)
    w_eff = wa_eff + wb_eff                   # emb_b == emb_a -> one combined vector
    gates = atten_mech_gate(a_embs, w_eff, c_eff)                           # (E,)

    # Scatter gates into the dense weight matrix (XLA glue; duplicate (row,col)
    # pairs keep last-write-wins semantics like the PyTorch fancy assignment).
    # TODO(synk): fuse gate + scatter + aggregation into one pallas_call using
    # PrefetchScalarGridSpec (row/col indices in SMEM) so the (B, U) matrix
    # never round-trips through HBM.
    weight_matrix = jnp.zeros((B, U), jnp.float32).at[
        jnp.asarray(row_idx, jnp.int32), jnp.asarray(col_idx, jnp.int32)].set(gates)

    embed_matrix = feature_table[jnp.asarray(uniq, dtype=jnp.int32)]        # (U, D)
    to_feats = aggregate(weight_matrix, embed_matrix)
    return to_feats, gates


# ----------------------------------------------------------------------------
# Pure-JAX reference (literal two-Linear AttenMech) for validation.
# ----------------------------------------------------------------------------
def atten_mech_ref(emb_a, emb_b, W1, b1, W2, b2):
    a = emb_a @ W1.T + b1
    b = emb_b @ W1.T + b1
    s = jnp.concatenate([a, b], axis=-1) @ W2.T + b2       # (E, 1)
    return jnp.where(s > 0, s, 0.01 * s)[:, 0]


def reference_forward(feature_table, W1, b1, W2, b2, nodes, num_sample=10):
    nodes = [int(n) for n in nodes]
    N, D = feature_table.shape
    row_idx, col_idx, node_a_list, uniq = _build_edges(nodes, num_sample, N)
    B, U = len(nodes), len(uniq)
    a = feature_table[jnp.asarray(node_a_list, dtype=jnp.int32)]
    gates = atten_mech_ref(a, a, W1, b1, W2, b2)
    Wm = jnp.zeros((B, U), jnp.float32).at[
        jnp.asarray(row_idx, jnp.int32), jnp.asarray(col_idx, jnp.int32)].set(gates)
    Wm = Wm / jnp.sum(Wm, axis=1, keepdims=True)
    emb = feature_table[jnp.asarray(uniq, dtype=jnp.int32)]
    return Wm @ emb, gates


if __name__ == "__main__":
    key = jax.random.PRNGKey(0)
    k_feat, k_w1, k_b1, k_w2, k_b2 = jax.random.split(key, 5)

    NUM_NODES = 256
    EMB_SIZE = 128                 # lane-aligned feature width
    MID_SIZE = EMB_SIZE // 2       # AttenMech default mid_size
    BATCH = 8
    NUM_SAMPLE = 10

    feature_table = jax.random.normal(k_feat, (NUM_NODES, EMB_SIZE), dtype=jnp.float32)
    # AttenMech parameters: lin[0]: emb->mid, lin[1]: 2*mid->1 (xavier-ish scale).
    W1 = jax.random.normal(k_w1, (MID_SIZE, EMB_SIZE), jnp.float32) / np.sqrt(EMB_SIZE)
    b1 = jax.random.normal(k_b1, (MID_SIZE,), jnp.float32) * 0.1
    W2 = jax.random.normal(k_w2, (1, 2 * MID_SIZE), jnp.float32) / np.sqrt(2 * MID_SIZE)
    b2 = jax.random.normal(k_b2, (1,), jnp.float32) * 0.1

    nodes = list(range(BATCH))

    out, gates = atten_aggregator_forward(feature_table, W1, b1, W2, b2, nodes, NUM_SAMPLE)
    out = jax.block_until_ready(out)
    gates = jax.block_until_ready(gates)

    ref_out, ref_gates = reference_forward(feature_table, W1, b1, W2, b2, nodes, NUM_SAMPLE)

    np.testing.assert_allclose(np.asarray(gates), np.asarray(ref_gates), rtol=1e-4, atol=1e-5)
    np.testing.assert_allclose(np.asarray(out), np.asarray(ref_out), rtol=1e-4, atol=1e-5)

    print("KERNEL_OK")
</pallas_src>

<mosaic_0001>
module attributes {stable_mosaic.version = 11 : i64} {
  func.func @_gate_kernel(%arg0: i32, %arg1: memref<1x128x128xf32, #tpu.memory_space<vmem>>, %arg2: memref<128x1xf32, #tpu.memory_space<vmem>>, %arg3: memref<1x1xf32, #tpu.memory_space<vmem>>, %arg4: memref<1x1x128xf32, #tpu.memory_space<vmem>>) attributes {dimension_semantics = [#tpu.dimension_semantics<parallel>], iteration_bounds = array<i64: 1>, scalar_prefetch = 0 : i64, scratch_operands = 0 : i64, tpu.core_type = #tpu.core_type<tc>, window_params = [{transform_indices = @transform_0, window_bounds = array<i64: 1, 128, 128>}, {pipeline_mode = #tpu.pipeline_mode<synchronous>, transform_indices = @transform_1, window_bounds = array<i64: 128, 1>}, {pipeline_mode = #tpu.pipeline_mode<synchronous>, transform_indices = @transform_2, window_bounds = array<i64: 1, 1>}, {transform_indices = @transform_3, window_bounds = array<i64: 1, 1, 128>}]} {
    %c0 = arith.constant 0 : index
    %c0_0 = arith.constant 0 : index
    %0 = vector.load %arg2[%c0, %c0_0] : memref<128x1xf32, #tpu.memory_space<vmem>>, vector<128x1xf32>
    %c0_1 = arith.constant 0 : index
    %c0_2 = arith.constant 0 : index
    %1 = vector.load %arg3[%c0_1, %c0_2] : memref<1x1xf32, #tpu.memory_space<vmem>>, vector<1x1xf32>
    %c0_3 = arith.constant 0 : index
    %c0_4 = arith.constant 0 : index
    %c0_5 = arith.constant 0 : index
    %2 = vector.load %arg1[%c0_3, %c0_4, %c0_5] : memref<1x128x128xf32, #tpu.memory_space<vmem>>, vector<1x128x128xf32>
    %3 = vector.shape_cast %2 : vector<1x128x128xf32> to vector<128x128xf32>
    %4 = vector.broadcast %0 : vector<128x1xf32> to vector<128x128xf32>
    %5 = arith.mulf %3, %4 : vector<128x128xf32>
    %cst = arith.constant dense<0.000000e+00> : vector<128xf32>
    %6 = vector.multi_reduction <add>, %5, %cst [0] : vector<128x128xf32> to vector<128xf32>
    %7 = vector.shape_cast %6 : vector<128xf32> to vector<1x128xf32>
    %8 = vector.broadcast %1 : vector<1x1xf32> to vector<1x128xf32>
    %9 = arith.addf %7, %8 : vector<1x128xf32>
    %cst_6 = arith.constant 0.000000e+00 : f32
    %10 = vector.broadcast %cst_6 : f32 to vector<1x128xf32>
    %11 = arith.cmpf ogt, %9, %10 : vector<1x128xf32>
    %cst_7 = arith.constant 0.00999999977 : f32
    %12 = vector.broadcast %cst_7 : f32 to vector<1x128xf32>
    %13 = arith.mulf %12, %9 : vector<1x128xf32>
    %14 = arith.select %11, %9, %13 : vector<1x128xi1>, vector<1x128xf32>
    %c0_8 = arith.constant 0 : index
    %c0_9 = arith.constant 0 : index
    %c0_10 = arith.constant 0 : index
    %15 = vector.load %arg4[%c0_8, %c0_9, %c0_10] : memref<1x1x128xf32, #tpu.memory_space<vmem>>, vector<1x1x128xf32>
    %16 = vector.shape_cast %15 : vector<1x1x128xf32> to vector<1x128xf32>
    %17 = vector.shape_cast %14 : vector<1x128xf32> to vector<1x1x128xf32>
    tpu.vector_store %arg4[%c0_8, %c0_9, %c0_10], %17 {strides = array<i32>} : memref<1x1x128xf32, #tpu.memory_space<vmem>>, vector<1x1x128xf32>,
    return
  }
  func.func @transform_0(%arg0: i32) -> (i32, i32, i32) {
    %c0_i32 = arith.constant 0 : i32
    %c0_i32_0 = arith.constant 0 : i32
    %c0_i32_1 = arith.constant 0 : i32
    return %arg0, %c0_i32, %c0_i32_0 : i32, i32, i32
  }
  func.func @transform_1(%arg0: i32) -> (i32, i32) {
    %c0_i32 = arith.constant 0 : i32
    %c0_i32_0 = arith.constant 0 : i32
    %c0_i32_1 = arith.constant 0 : i32
    return %c0_i32, %c0_i32_0 : i32, i32
  }
  func.func @transform_2(%arg0: i32) -> (i32, i32) {
    %c0_i32 = arith.constant 0 : i32
    %c0_i32_0 = arith.constant 0 : i32
    %c0_i32_1 = arith.constant 0 : i32
    return %c0_i32, %c0_i32_0 : i32, i32
  }
  func.func @transform_3(%arg0: i32) -> (i32, i32, i32) {
    %c0_i32 = arith.constant 0 : i32
    %c0_i32_0 = arith.constant 0 : i32
    %c0_i32_1 = arith.constant 0 : i32
    return %arg0, %c0_i32, %c0_i32_0 : i32, i32, i32
  }
}

</mosaic_0001>

<bundles_post_ra>
// kernel: tpu_custom_call.1
= control target key start
LH: loop header
LB: loop body
LE: loop exit
PB: predicated region body
PF: predicated region fallthrough
CT: control target
= control target key end

     0   :  { %s349_s0 = inlined_call_operand.vmem [shape: f32[1,128,128], index: 0, kind: input, shape index: {}]   ;;  %s350_s1 = inlined_call_operand.vmem [shape: f32[128,1], index: 1, kind: input, shape index: {}]   ;;  %s351_s2 = inlined_call_operand.<no memory space> [shape: f32[1,1], index: 2, kind: input, shape index: {}]   ;;  %s352_s3 = inlined_call_operand.hbm [shape: f32[1,1,128], index: 3, kind: output, shape index: {}]  }
   0x1   :  { %v8_v0 = vstv %s351_s2 }
   0x2   :  { %9 = vst [vmem:[#allocation2] sm:$0x1] %v8_v0 }
   0x3   :  { %v21_v1 = vld [vmem:[%s350_s1 + $0x20] sm:$0xff]  ;;  %v19_v2 = vld [vmem:[%s350_s1 + $0x10] sm:$0xff]  ;;  %v225_v4 = vmov 0  }
   0x4   :  { %v17_v3 = vld [vmem:[%s350_s1] sm:$0xff]  ;;  %198 = vset.pattern.permute.xlu2 %v225_v4  ;;  %197 = vset.pattern.permute.xlu1 %v225_v4 }
   0x5   :  { %196 = vset.pattern.permute.xlu0 %v225_v4  ;;  %72 = vperm.xlu2 %198, %v21_v1  }
   0x6   :  { %62 = vperm.xlu1 %197, %v19_v2   ;;  %52 = vperm.xlu0 %196, %v17_v3  }
   0x7   :  { %10 = vsyncpa [#allocation4], 0  ;;  %v22_v5 = vld [vmem:[%s350_s1 + $0x28] sm:$0xff]  ;;  %v20_v6 = vld [vmem:[%s350_s1 + $0x18] sm:$0xff]  ;;  %s226_s20 = smov [#allocation3]  }
   0x8   :  { %v18_v7 = vld [vmem:[%s350_s1 + $0x8] sm:$0xff]  ;;  %v25_v8 = vld [vmem:[%s350_s1 + $0x40] sm:$0xff]  ;;  %v24_v9 = vld [vmem:[%s350_s1 + $0x38] sm:$0xff]  ;;  %s183_s21 = sshll.u32 %s226_s20, 4  ;;  %s184_s21 = int_to_ptr.vmem [resolvable:$true] %s183_s21 }
   0x9   :  { %v23_v10 = vld [vmem:[%s350_s1 + $0x30] sm:$0xff]  ;;  %v28_v11 = vld [vmem:[%s350_s1 + $0x58] sm:$0xff]  ;;  %v26_v13 = vld [vmem:[%s350_s1 + $0x48] sm:$0xff] }
   0xa   :  { %v27_v12 = vld [vmem:[%s350_s1 + $0x50] sm:$0xff]  ;;  %v30_v15 = vld [vmem:[%s350_s1 + $0x68] sm:$0xff]  ;;  %v29_v16 = vld [vmem:[%s350_s1 + $0x60] sm:$0xff] }
   0xb   :  { %v31_v14 = vld [vmem:[%s350_s1 + $0x70] sm:$0xff]  ;;  %v33_v17 = vld [vmem:[#allocation2] sm:$0x1]  ;;  %v32_v18 = vld [vmem:[%s350_s1 + $0x78] sm:$0xff] }
   0xc   :  { %v34_v23 = vld [vmem:[%s349_s0] sm:$0xff]  ;;  %v35_v24 = vld [vmem:[%s349_s0 + $0x8] sm:$0xff]  ;;  %v36_v25 = vld [vmem:[%s349_s0 + $0x10] sm:$0xff] }
   0xd   :  { %77 = vperm.xlu2 %198, %v22_v5   ;;  %v37_v30 = vld [vmem:[%s349_s0 + $0x18] sm:$0xff]  ;;  %v38_v33 = vld [vmem:[%s349_s0 + $0x20] sm:$0xff]  ;;  %v39_v36 = vld [vmem:[%s349_s0 + $0x28] sm:$0xff] }
   0xe   :  { %67 = vperm.xlu1 %197, %v20_v6   ;;  %57 = vperm.xlu0 %196, %v18_v7   ;;  %v40_v41 = vld [vmem:[%s349_s0 + $0x30] sm:$0xff]  ;;  %v41_v45 = vld [vmem:[%s349_s0 + $0x38] sm:$0xff]  ;;  %v42_v48 = vld [vmem:[%s349_s0 + $0x40] sm:$0xff] }
   0xf   :  { %v43_v51 = vld [vmem:[%s349_s0 + $0x48] sm:$0xff]  ;;  %v44_v54 = vld [vmem:[%s349_s0 + $0x50] sm:$0xff]  ;;  %v45_v62 = vld [vmem:[%s349_s0 + $0x58] sm:$0xff] }
  0x10   :  { %v46_v0 = vld [vmem:[%s349_s0 + $0x60] sm:$0xff]  ;;  %v47_v2 = vld [vmem:[%s349_s0 + $0x68] sm:$0xff] }
  0x15   :  { %92 = vperm.xlu2 %198, %v25_v8  }
  0x16   :  { %87 = vperm.xlu1 %197, %v24_v9   ;;  %82 = vperm.xlu0 %196, %v23_v10   ;;  %v48_v9 = vld [vmem:[%s349_s0 + $0x70] sm:$0xff] }
  0x1d   :  { %107 = vperm.xlu2 %198, %v28_v11  }
  0x1e   :  { %102 = vperm.xlu1 %197, %v27_v12   ;;  %97 = vperm.xlu0 %196, %v26_v13   ;;  %v49_v12 = vld [vmem:[%s349_s0 + $0x78] sm:$0xff]  ;;  %s185_s0 = sshll.u32 %s352_s3, 4  ;;  %s186_s0 = int_to_ptr.hbm [resolvable:$true] %s185_s0 }
  0x25   :  { %122 = vperm.xlu2 %198, %v31_v14  }
  0x26   :  { %117 = vperm.xlu1 %197, %v30_v15   ;;  %112 = vperm.xlu0 %196, %v29_v16  }
  0x2e   :  { %169 = vperm.xlu1 %197, %v33_v17   ;;  %127 = vperm.xlu0 %196, %v32_v18  }
  0x5f   :  { %v73_v19 = vpop.permute.xlu2 %72 }
  0x60   :  { %v134_v37 = vmul.f32 %v73_v19, %v38_v33 }
  0x67   :  { %v78_v22 = vpop.permute.xlu2 %77 }
  0x68   :  { %v135_v43 = vmul.f32 %v78_v22, %v39_v36 }
  0x6f   :  { %v93_v38 = vpop.permute.xlu2 %92 }
  0x70   :  { %v138_v52 = vmul.f32 %v93_v38, %v42_v48 }
  0x77   :  { %v108_v59 = vpop.permute.xlu2 %107 }
  0x78   :  { %v63_v20 = vpop.permute.xlu1 %62  ;;  %v53_v21 = vpop.permute.xlu0 %52  ;;  %v141_v1 = vmul.f32 %v108_v59, %v45_v62 }
  0x79   :  { %v130_v28 = vmul.f32 %v53_v21, %v34_v23  ;;  %v132_v31 = vmul.f32 %v63_v20, %v36_v25 }
  0x7f   :  { %v123_v10 = vpop.permute.xlu2 %122 }
  0x80   :  { %v68_v26 = vpop.permute.xlu1 %67  ;;  %v58_v27 = vpop.permute.xlu0 %57  ;;  %v144_v13 = vmul.f32 %v123_v10, %v48_v9 }
  0x81   :  { %v131_v29 = vmul.f32 %v58_v27, %v35_v24  ;;  %v133_v34 = vmul.f32 %v68_v26, %v37_v30 }
  0x83   :  { %v146_v32 = vadd.f32 %v131_v29, %v130_v28 }
  0x85   :  { %v147_v35 = vadd.f32 %v146_v32, %v132_v31 }
  0x87   :  { %v148_v39 = vadd.f32 %v147_v35, %v133_v34 }
  0x88   :  { %v88_v40 = vpop.permute.xlu1 %87  ;;  %v83_v42 = vpop.permute.xlu0 %82 }
  0x89   :  { %v149_v44 = vadd.f32 %v148_v39, %v134_v37  ;;  %v136_v47 = vmul.f32 %v83_v42, %v40_v41  ;;  %v137_v49 = vmul.f32 %v88_v40, %v41_v45 }
  0x8b   :  { %v150_v46 = vadd.f32 %v149_v44, %v135_v43 }
  0x8d   :  { %v151_v50 = vadd.f32 %v150_v46, %v136_v47 }
  0x8f   :  { %v152_v53 = vadd.f32 %v151_v50, %v137_v49 }
  0x90   :  { %v103_v55 = vpop.permute.xlu1 %102  ;;  %v98_v56 = vpop.permute.xlu0 %97 }
  0x91   :  { %v153_v57 = vadd.f32 %v152_v53, %v138_v52  ;;  %v139_v58 = vmul.f32 %v98_v56, %v43_v51  ;;  %v140_v60 = vmul.f32 %v103_v55, %v44_v54 }
  0x93   :  { %v154_v61 = vadd.f32 %v153_v57, %v139_v58 }
  0x95   :  { %v155_v63 = vadd.f32 %v154_v61, %v140_v60 }
  0x97   :  { %v156_v5 = vadd.f32 %v155_v63, %v141_v1 }
  0x98   :  { %v118_v3 = vpop.permute.xlu1 %117  ;;  %v113_v4 = vpop.permute.xlu0 %112 }
  0x99   :  { %v142_v6 = vmul.f32 %v113_v4, %v46_v0  ;;  %v143_v7 = vmul.f32 %v118_v3, %v47_v2 }
  0x9b   :  { %v157_v8 = vadd.f32 %v156_v5, %v142_v6 }
  0x9d   :  { %v158_v11 = vadd.f32 %v157_v8, %v143_v7 }
  0x9f   :  { %v159_v15 = vadd.f32 %v158_v11, %v144_v13 }
  0xa0   :  { %v128_v14 = vpop.permute.xlu0 %127  ;;  %v170_v22 = vpop.permute.xlu1 %169 }
  0xa1   :  { %v145_v16 = vmul.f32 %v128_v14, %v49_v12  ;;  %v172_v24 = vperm.slane %v170_v22, 0 }
  0xa3   :  { %v160_v17 = vadd.f32 %v159_v15, %v145_v16 }
  0xa5   :  { %v161_v18 = vrot.slane %v160_v17, 4 }
  0xa7   :  { %v162_v19 = vadd.f32 %v161_v18, %v160_v17 }
  0xa9   :  { %v163_v20 = vrot.slane %v162_v19, 2 }
  0xab   :  { %v164_v21 = vadd.f32 %v163_v20, %v162_v19 }
  0xad   :  { %v165_v23 = vrot.slane %v164_v21, 1 }
  0xaf   :  { %v166_v25 = vadd.f32 %v165_v23, %v164_v21 }
  0xb1   :  { %v173_v26 = vadd.f32 %v172_v24, %v166_v25 }
  0xb3   :  { %vm174_vm0 = vcmp.gt.f32.partialorder %v173_v26, 0.0  ;;  %v175_v27 = vmul.f32 0.01, %v173_v26 }
  0xb5   :  { %v176_v28 = vsel %vm174_vm0, %v173_v26, %v175_v27 }
  0xb6   :  { %177 = vst [vmem:[#allocation3] sm:$0x1] %v176_v28 }
  0xb7   :  { %188 = dma.vmem_to_hbm [thread:$0]  %s184_s21, 16, %s186_s0, [#allocation4]  }
  0xb8   :  { %223 = dma.done.wait [#allocation4], 16  }
  0xb9   :  { %224 = vsyncadd [#allocation4], 4294967280 }
  0xba   :  { %193 = vsyncpa [#allocation4], 1 }

</bundles_post_ra>
